<compile_context>
chip_gen: v6e
topology: v6e:2x2x1
jax: 0.10.0
libtpu: 0.0.40
codegen_flags: <defaults>
</compile_context>

<pallas_src>
import jax
import jax.numpy as jnp
import numpy as np
from jax.experimental import pallas as pl
from jax.experimental.pallas import tpu as pltpu


def _round_up(x, m):
    return ((x + m - 1) // m) * m


def _make_critic_kernel(n_hidden):
    """Build a kernel for `n_hidden` hidden layers, operating on a
    transposed (features, batch-tile) layout."""

    def kernel(*refs):
        # refs = (x_ref, w1, b1, ..., wn, bn, wo, bo, q_ref)
        x_ref = refs[0]
        wo_ref = refs[1 + 2 * n_hidden]
        bo_ref = refs[2 + 2 * n_hidden]
        q_ref = refs[3 + 2 * n_hidden]

        neg = jnp.float32(0.01)
        h = x_ref[...]                                     # (Din, TB)
        for l in range(n_hidden):
            w = refs[1 + 2 * l][...]                       # (H_out, H_in)
            b = refs[2 + 2 * l][...]                       # (H_out, 1)
            h = jnp.dot(w, h, preferred_element_type=jnp.float32) + b
            h = jnp.maximum(h, neg * h)                    # leaky_relu(0.01)

        # Output head (1 unit): VPU multiply + cross-sublane reduce gives a
        # lane-dense (1, TB) row -- no N=1 MXU matmul, no masked lane stores.
        q = jnp.sum(h * wo_ref[...], axis=0, keepdims=True) + bo_ref[...]
        q_ref[...] = q.astype(q_ref.dtype)

    return kernel


_TB_CAP = 4096  # rows per grid step (batch lives on lanes inside the kernel)


@jax.jit
def critic_forward(state, actions, action_parameters, params):
    """Pallas critic forward.  Returns Q of shape (B, 1), float32."""
    n_hidden = (len(params) - 2) // 2
    layer_ws = [params[2 * l] for l in range(n_hidden)]
    layer_bs = [params[2 * l + 1] for l in range(n_hidden)]
    wo, bo = params[-2], params[-1]

    B = state.shape[0]
    Din = state.shape[1] + actions.shape[1] + action_parameters.shape[1]

    # Fused concat (one XLA fusion) + transpose to (features, batch): the
    # batch axis lands on lanes, so the input DMA and the Q output are
    # lane-dense and the layer matmuls put their big dim on the MXU N axis.
    x = jnp.concatenate([state, actions, action_parameters],
                        axis=1).astype(jnp.float32)        # (B, Din)
    x_t = x.T                                              # (Din, B)

    # Batch tiling: lane-aligned (multiple of 128), capped at _TB_CAP; for
    # B > 128 ensure >= 2 grid steps so the "parallel" axis can shard across
    # v7x's two TensorCores.  Tiny batches use one full-extent tile.
    if B <= 128:
        TB = B
    else:
        TB = min(_TB_CAP, _round_up(-(-B // 2), 128))
    Bp = _round_up(B, TB)
    if Bp != B:
        # Pads only the freshly produced slab (fuses with the concat /
        # transpose producer); the original inputs are not re-read.
        x_t = jnp.pad(x_t, ((0, 0), (0, Bp - B)))

    kernel = _make_critic_kernel(n_hidden)

    def const_spec(arr):
        return pl.BlockSpec(arr.shape, lambda i: (0, 0))   # resident weights

    in_specs = [pl.BlockSpec((Din, TB), lambda i: (0, i))]
    operands = [x_t]
    for w, b in zip(layer_ws, layer_bs):
        in_specs += [const_spec(w), const_spec(b)]
        operands += [w, b]
    in_specs += [const_spec(wo), const_spec(bo)]
    operands += [wo, bo]

    q_row = pl.pallas_call(
        kernel,
        out_shape=jax.ShapeDtypeStruct((1, Bp), jnp.float32),
        grid=(Bp // TB,),
        in_specs=in_specs,
        out_specs=pl.BlockSpec((1, TB), lambda i: (0, i)),
        compiler_params=pltpu.CompilerParams(
            dimension_semantics=("parallel",)),
    )(*operands)

    return q_row[0, :B].reshape(B, 1)


def init_critic_params(key, state_size, action_size, action_parameter_size,
                       hidden_layers, init_std=0.01):
    """Matches the PyTorch __init__ (init_type='normal'):
    weights ~ Normal(0, init_std), biases = 0.
    Hidden weights kept in PyTorch (out_features, in_features) layout (the
    kernel left-multiplies the transposed activations); biases stored as
    (out_features, 1) columns; output weight as an (H_last, 1) column."""
    input_size = state_size + action_size + action_parameter_size
    dims = [input_size] + list(hidden_layers)

    keys = jax.random.split(key, len(hidden_layers) + 1)
    params = []
    for i in range(len(hidden_layers)):
        w = init_std * jax.random.normal(keys[i], (dims[i + 1], dims[i]),
                                         dtype=jnp.float32)
        b = jnp.zeros((dims[i + 1], 1), dtype=jnp.float32)
        params.extend([w, b])
    wo = init_std * jax.random.normal(keys[-1], (dims[-1], 1),
                                      dtype=jnp.float32)
    bo = jnp.zeros((1, 1), dtype=jnp.float32)
    params.extend([wo, bo])
    return tuple(params)


def critic_reference(state, actions, action_parameters, params):
    """Plain-JAX reference (standard (batch, features) orientation)."""
    x = jnp.concatenate([state, actions, action_parameters], axis=1)
    n_hidden = (len(params) - 2) // 2
    h = x
    for l in range(n_hidden):
        w, b = params[2 * l], params[2 * l + 1]
        h = h @ w.T + b.T
        h = jnp.where(h >= 0, h, 0.01 * h)
    wo, bo = params[-2], params[-1]
    return h @ wo + bo


if __name__ == "__main__":
    # TODO(synk): the hidden_layers=None (no hidden layer) configuration of
    # the PyTorch module is not implemented; >=1 hidden layers are supported.
    state_size = 8
    action_size = 4
    action_parameter_size = 4
    hidden_layers = (32, 32)

    key = jax.random.PRNGKey(0)
    params = init_critic_params(jax.random.fold_in(key, 1), state_size,
                                action_size, action_parameter_size,
                                hidden_layers)

    # Aligned tiny batch, unaligned tiny batch, and a multi-tile batch that
    # exercises the padded / multi-grid-step ("parallel") path.
    for batch in (8, 50, 300):
        ks, ka, kp = jax.random.split(jax.random.fold_in(key, batch), 3)
        state = jax.random.normal(ks, (batch, state_size), dtype=jnp.float32)
        actions = jax.random.normal(ka, (batch, action_size),
                                    dtype=jnp.float32)
        action_parameters = jax.random.normal(
            kp, (batch, action_parameter_size), dtype=jnp.float32)

        q = critic_forward(state, actions, action_parameters, params)
        q = jax.block_until_ready(q)
        assert q.shape == (batch, 1)

        q_ref = critic_reference(state, actions, action_parameters, params)
        np.testing.assert_allclose(np.asarray(q), np.asarray(q_ref),
                                   rtol=1e-5, atol=1e-5)

    print("KERNEL_OK")
</pallas_src>

<mosaic_0001>
module attributes {stable_mosaic.version = 11 : i64} {
  func.func @kernel(%arg0: i32, %arg1: memref<16x8xf32, #tpu.memory_space<vmem>>, %arg2: memref<32x16xf32, #tpu.memory_space<vmem>>, %arg3: memref<32x1xf32, #tpu.memory_space<vmem>>, %arg4: memref<32x32xf32, #tpu.memory_space<vmem>>, %arg5: memref<32x1xf32, #tpu.memory_space<vmem>>, %arg6: memref<32x1xf32, #tpu.memory_space<vmem>>, %arg7: memref<1x1xf32, #tpu.memory_space<vmem>>, %arg8: memref<1x8xf32, #tpu.memory_space<vmem>>) attributes {dimension_semantics = [#tpu.dimension_semantics<parallel>], iteration_bounds = array<i64: 1>, scalar_prefetch = 0 : i64, scratch_operands = 0 : i64, tpu.core_type = #tpu.core_type<tc>, window_params = [{transform_indices = @transform_0, window_bounds = array<i64: 16, 8>}, {pipeline_mode = #tpu.pipeline_mode<synchronous>, transform_indices = @transform_1, window_bounds = array<i64: 32, 16>}, {pipeline_mode = #tpu.pipeline_mode<synchronous>, transform_indices = @transform_2, window_bounds = array<i64: 32, 1>}, {pipeline_mode = #tpu.pipeline_mode<synchronous>, transform_indices = @transform_3, window_bounds = array<i64: 32, 32>}, {pipeline_mode = #tpu.pipeline_mode<synchronous>, transform_indices = @transform_4, window_bounds = array<i64: 32, 1>}, {pipeline_mode = #tpu.pipeline_mode<synchronous>, transform_indices = @transform_5, window_bounds = array<i64: 32, 1>}, {pipeline_mode = #tpu.pipeline_mode<synchronous>, transform_indices = @transform_6, window_bounds = array<i64: 1, 1>}, {transform_indices = @transform_7, window_bounds = array<i64: 1, 8>}]} {
    %c0 = arith.constant 0 : index
    %c0_0 = arith.constant 0 : index
    %0 = vector.load %arg1[%c0, %c0_0] : memref<16x8xf32, #tpu.memory_space<vmem>>, vector<16x8xf32>
    %c0_1 = arith.constant 0 : index
    %c0_2 = arith.constant 0 : index
    %1 = vector.load %arg2[%c0_1, %c0_2] : memref<32x16xf32, #tpu.memory_space<vmem>>, vector<32x16xf32>
    %c0_3 = arith.constant 0 : index
    %c0_4 = arith.constant 0 : index
    %2 = vector.load %arg3[%c0_3, %c0_4] : memref<32x1xf32, #tpu.memory_space<vmem>>, vector<32x1xf32>
    %cst = arith.constant dense<0.000000e+00> : vector<32x8xf32>
    %3 = tpu.matmul %1, %0, %cst {dimension_numbers = #tpu.dot_dimension_numbers<[1], [0], [0], [1], [0, 0, 1, 1], [], []>} : vector<32x16xf32>, vector<16x8xf32>, vector<32x8xf32> -> vector<32x8xf32>
    %4 = vector.broadcast %2 : vector<32x1xf32> to vector<32x8xf32>
    %5 = arith.addf %3, %4 : vector<32x8xf32>
    %cst_5 = arith.constant 0.00999999977 : f32
    %6 = vector.broadcast %cst_5 : f32 to vector<32x8xf32>
    %7 = arith.mulf %6, %5 : vector<32x8xf32>
    %8 = arith.maximumf %5, %7 : vector<32x8xf32>
    %c0_6 = arith.constant 0 : index
    %c0_7 = arith.constant 0 : index
    %9 = vector.load %arg4[%c0_6, %c0_7] : memref<32x32xf32, #tpu.memory_space<vmem>>, vector<32x32xf32>
    %c0_8 = arith.constant 0 : index
    %c0_9 = arith.constant 0 : index
    %10 = vector.load %arg5[%c0_8, %c0_9] : memref<32x1xf32, #tpu.memory_space<vmem>>, vector<32x1xf32>
    %cst_10 = arith.constant dense<0.000000e+00> : vector<32x8xf32>
    %11 = tpu.matmul %9, %8, %cst_10 {dimension_numbers = #tpu.dot_dimension_numbers<[1], [0], [0], [1], [0, 0, 1, 1], [], []>} : vector<32x32xf32>, vector<32x8xf32>, vector<32x8xf32> -> vector<32x8xf32>
    %12 = vector.broadcast %10 : vector<32x1xf32> to vector<32x8xf32>
    %13 = arith.addf %11, %12 : vector<32x8xf32>
    %cst_11 = arith.constant 0.00999999977 : f32
    %14 = vector.broadcast %cst_11 : f32 to vector<32x8xf32>
    %15 = arith.mulf %14, %13 : vector<32x8xf32>
    %16 = arith.maximumf %13, %15 : vector<32x8xf32>
    %c0_12 = arith.constant 0 : index
    %c0_13 = arith.constant 0 : index
    %17 = vector.load %arg6[%c0_12, %c0_13] : memref<32x1xf32, #tpu.memory_space<vmem>>, vector<32x1xf32>
    %18 = vector.broadcast %17 : vector<32x1xf32> to vector<32x8xf32>
    %19 = arith.mulf %16, %18 : vector<32x8xf32>
    %cst_14 = arith.constant dense<0.000000e+00> : vector<8xf32>
    %20 = vector.multi_reduction <add>, %19, %cst_14 [0] : vector<32x8xf32> to vector<8xf32>
    %21 = vector.shape_cast %20 : vector<8xf32> to vector<1x8xf32>
    %c0_15 = arith.constant 0 : index
    %c0_16 = arith.constant 0 : index
    %22 = vector.load %arg7[%c0_15, %c0_16] : memref<1x1xf32, #tpu.memory_space<vmem>>, vector<1x1xf32>
    %23 = vector.broadcast %22 : vector<1x1xf32> to vector<1x8xf32>
    %24 = arith.addf %21, %23 : vector<1x8xf32>
    %c0_17 = arith.constant 0 : index
    %c0_18 = arith.constant 0 : index
    %25 = vector.load %arg8[%c0_17, %c0_18] : memref<1x8xf32, #tpu.memory_space<vmem>>, vector<1x8xf32>
    tpu.vector_store %arg8[%c0_17, %c0_18], %24 {strides = array<i32>} : memref<1x8xf32, #tpu.memory_space<vmem>>, vector<1x8xf32>,
    return
  }
  func.func @transform_0(%arg0: i32) -> (i32, i32) {
    %c0_i32 = arith.constant 0 : i32
    %c0_i32_0 = arith.constant 0 : i32
    return %c0_i32, %arg0 : i32, i32
  }
  func.func @transform_1(%arg0: i32) -> (i32, i32) {
    %c0_i32 = arith.constant 0 : i32
    %c0_i32_0 = arith.constant 0 : i32
    %c0_i32_1 = arith.constant 0 : i32
    return %c0_i32, %c0_i32_0 : i32, i32
  }
  func.func @transform_2(%arg0: i32) -> (i32, i32) {
    %c0_i32 = arith.constant 0 : i32
    %c0_i32_0 = arith.constant 0 : i32
    %c0_i32_1 = arith.constant 0 : i32
    return %c0_i32, %c0_i32_0 : i32, i32
  }
  func.func @transform_3(%arg0: i32) -> (i32, i32) {
    %c0_i32 = arith.constant 0 : i32
    %c0_i32_0 = arith.constant 0 : i32
    %c0_i32_1 = arith.constant 0 : i32
    return %c0_i32, %c0_i32_0 : i32, i32
  }
  func.func @transform_4(%arg0: i32) -> (i32, i32) {
    %c0_i32 = arith.constant 0 : i32
    %c0_i32_0 = arith.constant 0 : i32
    %c0_i32_1 = arith.constant 0 : i32
    return %c0_i32, %c0_i32_0 : i32, i32
  }
  func.func @transform_5(%arg0: i32) -> (i32, i32) {
    %c0_i32 = arith.constant 0 : i32
    %c0_i32_0 = arith.constant 0 : i32
    %c0_i32_1 = arith.constant 0 : i32
    return %c0_i32, %c0_i32_0 : i32, i32
  }
  func.func @transform_6(%arg0: i32) -> (i32, i32) {
    %c0_i32 = arith.constant 0 : i32
    %c0_i32_0 = arith.constant 0 : i32
    %c0_i32_1 = arith.constant 0 : i32
    return %c0_i32, %c0_i32_0 : i32, i32
  }
  func.func @transform_7(%arg0: i32) -> (i32, i32) {
    %c0_i32 = arith.constant 0 : i32
    %c0_i32_0 = arith.constant 0 : i32
    return %c0_i32, %arg0 : i32, i32
  }
}

</mosaic_0001>

<bundles_post_ra>
// kernel: critic_forward.1
= control target key start
LH: loop header
LB: loop body
LE: loop exit
PB: predicated region body
PF: predicated region fallthrough
CT: control target
= control target key end

     0   :  { %s562_s0 = inlined_call_operand.vmem [shape: f32[16,8], index: 0, kind: input, shape index: {}]   ;;  %s563_s1 = inlined_call_operand.vmem [shape: f32[32,16], index: 1, kind: input, shape index: {}]   ;;  %s564_s2 = inlined_call_operand.vmem [shape: f32[32,1], index: 2, kind: input, shape index: {}]   ;;  %s565_s3 = inlined_call_operand.vmem [shape: f32[32,32], index: 3, kind: input, shape index: {}]   ;;  %s566_s4 = inlined_call_operand.vmem [shape: f32[32,1], index: 4, kind: input, shape index: {}]   ;;  %s567_s5 = inlined_call_operand.vmem [shape: f32[32,1], index: 5, kind: input, shape index: {}]   ;;  %s568_s6 = inlined_call_operand.<no memory space> [shape: f32[1,1], index: 6, kind: input, shape index: {}]   ;;  %s569_s7 = inlined_call_operand.hbm [shape: f32[1,8], index: 7, kind: output, shape index: {}]  }
   0x1   :  { %v12_v0 = vstv %s568_s6 }
   0x2   :  { %13 = vst [vmem:[#allocation2] sm:$0x1] %v12_v0 }
   0x3   :  { %v30_v1 = vld [vmem:[%s562_s0 + $0x8] sm:$0xff]  ;;  %v29_v2 = vld [vmem:[%s562_s0] sm:$0xff]  ;;  %vm59_vm0 = vcmask 130048   ;;  %v440_v5 = vmov 0   ;;  %v38_v6 = vld [vmem:[%s564_s2 + $0x18] sm:$0xff] }
   0x4   :  { %v31_v3 = vld [vmem:[%s563_s1] sm:$0xff]  ;;  %390 = vmatprep.subr.mxu0 %v30_v1  ;;  %v32_v4 = vld [vmem:[%s563_s1 + $0x8] sm:$0xff]  ;;  %416 = vset.pattern.permute.xlu0 %v440_v5  ;;  %v33_v7 = vld [vmem:[%s563_s1 + $0x10] sm:$0xff] }
   0x5   :  { %394 = vmatprep.mubr.msk.f32.mxu0 %vm59_vm0, %v31_v3  ;;  %391 = vmatpush3.msra.mxu0 %v30_v1  ;;  %v36_v8 = vld [vmem:[%s564_s2 + $0x8] sm:$0xff]  ;;  %v37_v9 = vld [vmem:[%s564_s2 + $0x10] sm:$0xff]  ;;  %v34_v10 = vld [vmem:[%s563_s1 + $0x18] sm:$0xff] }
   0x6   :  { %392 = vmatprep.subr.mxu0 %v29_v2  ;;  %56 = vperm.xlu0 %416, %v38_v6   ;;  %v35_v11 = vld [vmem:[%s564_s2] sm:$0xff] }
   0x7   :  { %393 = vmatpush3.msra.mxu0 %v29_v2  ;;  %417 = vset.pattern.permute.xlu1 %v440_v5 }
   0x8   :  { %395 = vmatmul.mubr.msk.f32.vlgmr.msra.gmra.mxu0 %vm59_vm0, %v32_v4  ;;  %46 = vperm.xlu1 %417, %v36_v8  }
   0x9   :  { %397 = vmatprep.mubr.msk.f32.mxu0 %vm59_vm0, %v33_v7 }
   0xa   :  { %14 = vsyncpa [#allocation4], 0  ;;  %51 = vperm.xlu0 %416, %v37_v9   ;;  %v169_v12 = vld [vmem:[%s566_s4] sm:$0xff]  ;;  %v170_v13 = vld [vmem:[%s566_s4 + $0x8] sm:$0xff]  ;;  %vm193_vm1 = vcmask 261120   ;;  %vm327_vm2 = vcmask 64512  }
   0xb   :  { %v171_v14 = vld [vmem:[%s566_s4 + $0x10] sm:$0xff]  ;;  %v172_v15 = vld [vmem:[%s566_s4 + $0x18] sm:$0xff]  ;;  %v299_v16 = vld [vmem:[%s567_s5] sm:$0xff]  ;;  %vm352_vm3 = vcmask 57344  }
   0xc   :  { %398 = vmatmul.mubr.msk.f32.gmra.mxu0 %vm59_vm0, %v34_v10  ;;  %41 = vperm.xlu1 %417, %v35_v11   ;;  %v300_v17 = vld [vmem:[%s567_s5 + $0x8] sm:$0xff]  ;;  %v301_v18 = vld [vmem:[%s567_s5 + $0x10] sm:$0xff]  ;;  %v302_v19 = vld [vmem:[%s567_s5 + $0x18] sm:$0xff] }
   0xd   :  { %v341_v20 = vld [vmem:[#allocation2] sm:$0x1]  ;;  %v166_v42 = vld [vmem:[%s565_s3 + $0x8] sm:$0xff]  ;;  %v167_v43 = vld [vmem:[%s565_s3 + $0x10] sm:$0xff] }
   0xe   :  { %175 = vperm.xlu0 %416, %v169_v12   ;;  %v165_v21 = vld [vmem:[%s565_s3] sm:$0xff]  ;;  %v168_v44 = vld [vmem:[%s565_s3 + $0x18] sm:$0xff]  ;;  %s441_s3 = smov [#allocation3]  }
   0xf   :  { %408 = vmatprep.mubr.msk.f32.mxu1 %vm193_vm1, %v165_v21  ;;  %s360_s16 = sshll.u32 %s441_s3, 4  ;;  %s361_s16 = int_to_ptr.vmem [resolvable:$true] %s360_s16 }
  0x10   :  { %180 = vperm.xlu1 %417, %v170_v13   ;;  %s418_s17 = scalar_lea.vmem %s361_s16, 16  ;;  %s422_s18 = scalar_lea.vmem %s361_s16, 32 }
  0x11   :  { %p419_p0 = scmp.ne.s32.totalorder %s361_s16, %s418_s17  ;;  %p423_p1 = scmp.lt.s32.totalorder %s361_s16, %s361_s16 }
  0x12   :  { %185 = vperm.xlu0 %416, %v171_v14   ;;  %p424_p2 = scmp.lt.s32.totalorder %s422_s18, %s418_s17 }
  0x14   :  { %190 = vperm.xlu1 %417, %v172_v15   ;;  %v347_v15 = vlaneseq  ;;  %p425_p3 = por %p424_p2, %p423_p1 }
  0x16   :  { %305 = vperm.xlu0 %416, %v299_v16   ;;  %p426_p4 = pnand %p425_p3, %p419_p0 }
  0x18   :  { %310 = vperm.xlu1 %417, %v300_v17  }
  0x1a   :  { %315 = vperm.xlu0 %416, %v301_v18   ;;  %v348_v18 = vshrl.u32 %v347_v15, 7 }
  0x1c   :  { %320 = vperm.xlu1 %417, %v302_v19   ;;  %v349_v21 = vsub.s32 0, %v348_v18 }
  0x1e   :  { %344 = vperm.xlu0 %416, %v341_v20  }
  0x81   :  { %v57_v22 = vpop.permute.xlu0 %56 }
  0x83   :  { %v47_v23 = vpop.permute.xlu1 %46 }
  0x85   :  { %v52_v27 = vpop.permute.xlu0 %51 }
  0x87   :  { %v42_v30 = vpop.permute.xlu1 %41 }
  0x89   :  { %v176_v45 = vpop.permute.xlu0 %175 }
  0x8b   :  { %v181_v46 = vpop.permute.xlu1 %180 }
  0x8d   :  { %v186_v47 = vpop.permute.xlu0 %185 }
  0x8f   :  { %v191_v48 = vpop.permute.xlu1 %190 }
  0x91   :  { %v306_v55 = vpop.permute.xlu0 %305 }
  0x93   :  { %v311_v59 = vpop.permute.xlu1 %310 }
  0x95   :  { %v316_v6 = vpop.permute.xlu0 %315 }
  0x97   :  { %v321_v7 = vpop.permute.xlu1 %320 }
  0xc8   :  { %v396_v24 = vpop.f32.mrf.mxu0 }
  0xc9   :  { %v144_v28 = vadd.f32 %v396_v24, %v47_v23  ;;  %v345_v23 = vpop.permute.xlu0 %344 }
  0xca   :  { %v138_v25 = vpop.f32.mrf.mxu0 }
  0xcb   :  { %v139_v32 = vadd.f32 %v138_v25, %v42_v30  ;;  %v158_v35 = vmul.f32 0.01, %v144_v28  ;;  %v350_v25 = vrot.slane %v345_v23, %v349_v21 }
  0xcc   :  { %v399_v26 = vpop.f32.mrf.mxu0 }
  0xcd   :  { %v154_v29 = vadd.f32 %v399_v26, %v57_v22  ;;  %v157_v38 = vmul.f32 0.01, %v139_v32  ;;  %v162_v40 = vmax.f32 %v144_v28, %v158_v35 }
  0xce   :  { %v148_v31 = vpop.f32.mrf.mxu0 }
  0xcf   :  { %v160_v33 = vmul.f32 0.01, %v154_v29  ;;  %v149_v34 = vadd.f32 %v148_v31, %v52_v27  ;;  %v161_v41 = vmax.f32 %v139_v32, %v157_v38 }
  0xd1   :  { %v159_v36 = vmul.f32 0.01, %v149_v34  ;;  %v164_v37 = vmax.f32 %v154_v29, %v160_v33 }
  0xd3   :  { %v163_v39 = vmax.f32 %v149_v34, %v159_v36  ;;  %400 = vmatprep.subr.mxu1 %v164_v37 }
  0xd4   :  { %401 = vmatpush3.msra.mxu1 %v164_v37 }
  0xd5   :  { %402 = vmatprep.subr.mxu1 %v163_v39 }
  0xd6   :  { %403 = vmatpush3.msra.mxu1 %v163_v39 }
  0xd7   :  { %404 = vmatprep.subr.mxu1 %v162_v40 }
  0xd8   :  { %405 = vmatpush3.msra.mxu1 %v162_v40 }
  0xd9   :  { %406 = vmatprep.subr.mxu1 %v161_v41 }
  0xda   :  { %407 = vmatpush3.msra.mxu1 %v161_v41 }
  0xdb   :  { %409 = vmatmul.mubr.msk.f32.vlgmr.msra.gmra.mxu1 %vm193_vm1, %v166_v42 }
  0xdc   :  { %411 = vmatprep.mubr.msk.f32.mxu1 %vm193_vm1, %v167_v43 }
  0xdf   :  { %412 = vmatmul.mubr.msk.f32.gmra.mxu1 %vm193_vm1, %v168_v44 }
 0x19b   :  { %v410_v49 = vpop.f32.mrf.mxu1 }
 0x19c   :  { %v278_v50 = vadd.f32 %v410_v49, %v181_v46 }
 0x19d   :  { %v272_v51 = vpop.f32.mrf.mxu1 }
 0x19e   :  { %v292_v52 = vmul.f32 0.01, %v278_v50  ;;  %v273_v53 = vadd.f32 %v272_v51, %v176_v45 }
 0x19f   :  { %v413_v54 = vpop.f32.mrf.mxu1 }
 0x1a0   :  { %v296_v56 = vmax.f32 %v278_v50, %v292_v52  ;;  %v291_v57 = vmul.f32 0.01, %v273_v53  ;;  %v288_v58 = vadd.f32 %v413_v54, %v191_v48 }
 0x1a1   :  { %v282_v60 = vpop.f32.mrf.mxu1 }
 0x1a2   :  { %v295_v61 = vmax.f32 %v273_v53, %v291_v57  ;;  %v294_v62 = vmul.f32 0.01, %v288_v58  ;;  %v283_v63 = vadd.f32 %v282_v60, %v186_v47  ;;  %v324_v0 = vmul.f32 %v311_v59, %v296_v56 }
 0x1a4   :  { %v323_v1 = vmul.f32 %v306_v55, %v295_v61  ;;  %v298_v2 = vmax.f32 %v288_v58, %v294_v62  ;;  %v293_v3 = vmul.f32 0.01, %v283_v63  ;;  %v329_v8 = vsel %vm327_vm2, %v324_v0, 0.0 }
 0x1a6   :  { %v328_v4 = vsel %vm327_vm2, %v323_v1, 0.0  ;;  %v297_v5 = vmax.f32 %v283_v63, %v293_v3  ;;  %v326_v9 = vmul.f32 %v321_v7, %v298_v2 }
 0x1a7   :  { %v330_v11 = vadd.f32 %v329_v8, %v328_v4 }
 0x1a8   :  { %v325_v10 = vmul.f32 %v316_v6, %v297_v5  ;;  %v333_v14 = vsel %vm327_vm2, %v326_v9, 0.0 }
 0x1aa   :  { %v331_v12 = vsel %vm327_vm2, %v325_v10, 0.0 }
 0x1ab   :  { %v332_v13 = vadd.f32 %v331_v12, %v330_v11 }
 0x1ad   :  { %v334_v16 = vadd.f32 %v333_v14, %v332_v13 }
 0x1af   :  { %v335_v17 = vrot.slane %v334_v16, 4 }
 0x1b1   :  { %v336_v19 = vadd.f32 %v335_v17, %v334_v16 }
 0x1b3   :  { %v337_v20 = vrot.slane %v336_v19, 2 }
 0x1b5   :  { %v338_v22 = vadd.f32 %v337_v20, %v336_v19 }
 0x1b7   :  { %v339_v24 = vrot.slane %v338_v22, 1 }
 0x1b9   :  { %v340_v26 = vadd.f32 %v339_v24, %v338_v22 }
 0x1bb   :  { %v351_v27 = vadd.f32 %v350_v25, %v340_v26 }
 0x1bd   :  { %353 = vst.msk [vmem:[#allocation3] sm:$0x1] %vm352_vm3, %v351_v27 }
 0x1be   :  { %429 = shalt.err (!%p426_p4)
}
 0x1bf   :  { %363 = dma.vmem_to_hbm [thread:$0]  %s361_s16, 16, %s569_s7, [#allocation4]  }
 0x1c0   :  { %438 = dma.done.wait [#allocation4], 16  }
 0x1c1   :  { %439 = vsyncadd [#allocation4], 4294967280 }
 0x1c2   :  { %367 = vsyncpa [#allocation4], 1 }

</bundles_post_ra>
